<compile_context>
chip_gen: v7x
topology: tpu7x:2x2x1
jax: 0.10.0
libtpu: 0.0.40
codegen_flags: <defaults>
</compile_context>

<pallas_src>
import jax
import jax.numpy as jnp
from jax import lax
from jax.experimental import pallas as pl
from jax.experimental.pallas import tpu as pltpu

TILE_M = 512   # row tile for the fused conv+bn+relu matmul (multiple of 128)
K_PAD = 32     # contraction dim: 3*3*3 = 27 -> padded to 32
OC_PAD = 128   # output channels: 96 -> padded to 128 (lane-dense stores)


# ----------------------------- Pallas kernel -------------------------------

def conv_bn_relu_kernel(x_ref, w_ref, b_ref, o_ref):
    # x_ref: (TILE_M, K_PAD) bf16 im2col patches
    # w_ref: (K_PAD, OC_PAD) bf16 conv weight with BN scale folded in
    # b_ref: (1, OC_PAD)    f32 folded BN bias
    # o_ref: (TILE_M, OC_PAD) f32 output = relu(x @ w + b)
    acc = jnp.dot(x_ref[...], w_ref[...], preferred_element_type=jnp.float32)
    o_ref[...] = jnp.maximum(acc + b_ref[...], 0.0)


def conv_bn_relu_matmul(xcol, w2d, bias):
    Mp, Kp = xcol.shape
    _, OCp = w2d.shape
    cost = pl.CostEstimate(
        flops=2 * Mp * Kp * OCp,
        transcendentals=0,
        bytes_accessed=(Mp * Kp * xcol.dtype.itemsize
                        + Kp * OCp * w2d.dtype.itemsize
                        + OCp * 4
                        + Mp * OCp * 4),
    )
    return pl.pallas_call(
        conv_bn_relu_kernel,
        out_shape=jax.ShapeDtypeStruct((Mp, OCp), jnp.float32),
        grid=(Mp // TILE_M,),
        in_specs=[
            pl.BlockSpec((TILE_M, Kp), lambda i: (i, 0)),
            pl.BlockSpec((Kp, OCp), lambda i: (0, 0)),
            pl.BlockSpec((1, OCp), lambda i: (0, 0)),
        ],
        out_specs=pl.BlockSpec((TILE_M, OCp), lambda i: (i, 0)),
        compiler_params=pltpu.CompilerParams(dimension_semantics=("parallel",)),
        cost_estimate=cost,
    )(xcol, w2d, bias)


# ------------------------------- glue (JAX) --------------------------------

def im2col(x, kh, kw, stride):
    """x: NCHW -> (N*OH*OW, C*KH*KW), matching PyTorch weight.reshape(OC, -1)."""
    N, C, H, W = x.shape
    oh = (H - kh) // stride + 1
    ow = (W - kw) // stride + 1
    cols = []
    for i in range(kh):
        for j in range(kw):
            cols.append(x[:, :, i:i + stride * oh:stride, j:j + stride * ow:stride])
    col = jnp.stack(cols, axis=0)              # (kh*kw, N, C, oh, ow)
    col = col.transpose(1, 3, 4, 2, 0)          # (N, oh, ow, C, kh*kw)
    col = col.reshape(N * oh * ow, C * kh * kw)
    return col, oh, ow


def round_up(a, b):
    return (a + b - 1) // b * b


def init_params(key):
    """Deterministic synthetic parameters for the stem conv_0 (shapes from
    pnasnet5large: Conv2d(3, 96, 3, stride=2, bias=False) + BN(96, eps=1e-3))."""
    k0, k1, k2, k3, k4 = jax.random.split(key, 5)
    params = {
        "conv0_w": jax.random.normal(k0, (96, 3, 3, 3), jnp.float32) * 0.1,
        "bn_gamma": 1.0 + 0.1 * jax.random.normal(k1, (96,), jnp.float32),
        "bn_beta": 0.1 * jax.random.normal(k2, (96,), jnp.float32),
        "bn_mean": 0.1 * jax.random.normal(k3, (96,), jnp.float32),
        "bn_var": 1.0 + 0.1 * jnp.abs(jax.random.normal(k4, (96,), jnp.float32)),
    }
    return params


def pnasnet_feature_extractor(x, params):
    """forward: features(x) (stem conv_0 + BN implemented) then relu, all fused."""
    eps = 1e-3
    N = x.shape[0]
    OC = 96

    # --- im2col patches (kept in the XLA wrapper; see TODO(synk) above) ---
    col, oh, ow = im2col(x, 3, 3, 2)
    M, K = col.shape
    Mp = round_up(M, TILE_M)
    col_p = jnp.pad(col, ((0, Mp - M), (0, K_PAD - K))).astype(jnp.bfloat16)

    # --- fold BatchNorm into the conv weight / a single bias ---
    inv_std = 1.0 / jnp.sqrt(params["bn_var"] + eps)
    scale = params["bn_gamma"] * inv_std                                    # (96,)
    bias = params["bn_beta"] - params["bn_mean"] * scale                    # (96,)

    w2d = params["conv0_w"].reshape(OC, -1).T                               # (27, 96)
    w2d = w2d * scale[None, :]                                              # scale folded in
    w_p = jnp.pad(w2d, ((0, K_PAD - K), (0, OC_PAD - OC))).astype(jnp.bfloat16)
    b_p = jnp.pad(bias, ((0, OC_PAD - OC),)).reshape(1, OC_PAD).astype(jnp.float32)

    # --- fused conv_0 + BN + ReLU as one Pallas matmul kernel ---
    feat = conv_bn_relu_matmul(col_p, w_p, b_p)                             # (Mp, 128)

    # TODO(synk): cell_stem_0, cell_stem_1, cell_0..cell_11 of pnasnet5large
    # are not translated; `feat` here is the (relu'd) stem output.

    # strip the M / channel padding, back to NCHW
    out = feat[:M, :OC].reshape(N, oh, ow, OC).transpose(0, 3, 1, 2)
    return out


def reference_forward(x, params):
    """Plain-JAX f32 reference for correctness checking."""
    eps = 1e-3
    y = lax.conv_general_dilated(
        x, params["conv0_w"], window_strides=(2, 2), padding="VALID",
        dimension_numbers=("NCHW", "OIHW", "NCHW"))
    inv_std = 1.0 / jnp.sqrt(params["bn_var"] + eps)
    scale = (params["bn_gamma"] * inv_std)[None, :, None, None]
    shift = (params["bn_beta"] - params["bn_mean"] * params["bn_gamma"] * inv_std)[None, :, None, None]
    y = y * scale + shift
    return jnp.maximum(y, 0.0)


if __name__ == "__main__":
    key = jax.random.PRNGKey(0)
    kx, kp = jax.random.split(key)

    # small input consistent with the module (3-channel image, NCHW)
    x = jax.random.normal(kx, (2, 3, 16, 16), jnp.float32)
    params = init_params(kp)

    out = jax.jit(pnasnet_feature_extractor)(x, params)
    out = jax.block_until_ready(out)

    ref = reference_forward(x, params)
    assert out.shape == ref.shape == (2, 96, 7, 7), out.shape
    # bf16 MXU operands vs f32 reference -> loosened tolerance (per review)
    assert jnp.allclose(out, ref, atol=5e-2, rtol=5e-2), float(jnp.max(jnp.abs(out - ref)))

    print("KERNEL_OK")
</pallas_src>

<mosaic_0001>
module attributes {stable_mosaic.version = 11 : i64} {
  func.func @conv_bn_relu_kernel(%arg0: i32, %arg1: memref<512x32xbf16, #tpu.memory_space<vmem>>, %arg2: memref<32x128xbf16, #tpu.memory_space<vmem>>, %arg3: memref<1x128xf32, #tpu.memory_space<vmem>>, %arg4: memref<512x128xf32, #tpu.memory_space<vmem>>) attributes {dimension_semantics = [#tpu.dimension_semantics<parallel>], iteration_bounds = array<i64: 1>, scalar_prefetch = 0 : i64, scratch_operands = 0 : i64, tpu.core_type = #tpu.core_type<tc>, window_params = [{transform_indices = @transform_0, window_bounds = array<i64: 512, 32>}, {pipeline_mode = #tpu.pipeline_mode<synchronous>, transform_indices = @transform_1, window_bounds = array<i64: 32, 128>}, {pipeline_mode = #tpu.pipeline_mode<synchronous>, transform_indices = @transform_2, window_bounds = array<i64: 1, 128>}, {transform_indices = @transform_3, window_bounds = array<i64: 512, 128>}]} {
    %c0 = arith.constant 0 : index
    %c0_0 = arith.constant 0 : index
    %0 = vector.load %arg1[%c0, %c0_0] : memref<512x32xbf16, #tpu.memory_space<vmem>>, vector<512x32xbf16>
    %c0_1 = arith.constant 0 : index
    %c0_2 = arith.constant 0 : index
    %1 = vector.load %arg2[%c0_1, %c0_2] : memref<32x128xbf16, #tpu.memory_space<vmem>>, vector<32x128xbf16>
    %cst = arith.constant dense<0.000000e+00> : vector<512x128xf32>
    %2 = tpu.matmul %0, %1, %cst {dimension_numbers = #tpu.dot_dimension_numbers<[1], [0], [0], [1], [0, 0, 1, 1], [], []>} : vector<512x32xbf16>, vector<32x128xbf16>, vector<512x128xf32> -> vector<512x128xf32>
    %c0_3 = arith.constant 0 : index
    %c0_4 = arith.constant 0 : index
    %3 = vector.load %arg3[%c0_3, %c0_4] : memref<1x128xf32, #tpu.memory_space<vmem>>, vector<1x128xf32>
    %4 = vector.broadcast %3 : vector<1x128xf32> to vector<512x128xf32>
    %5 = arith.addf %2, %4 : vector<512x128xf32>
    %cst_5 = arith.constant 0.000000e+00 : f32
    %6 = vector.broadcast %cst_5 : f32 to vector<512x128xf32>
    %7 = arith.maximumf %5, %6 : vector<512x128xf32>
    %c0_6 = arith.constant 0 : index
    %c0_7 = arith.constant 0 : index
    %8 = vector.load %arg4[%c0_6, %c0_7] : memref<512x128xf32, #tpu.memory_space<vmem>>, vector<512x128xf32>
    tpu.vector_store %arg4[%c0_6, %c0_7], %7 {strides = array<i32>} : memref<512x128xf32, #tpu.memory_space<vmem>>, vector<512x128xf32>,
    return
  }
  func.func @transform_0(%arg0: i32) -> (i32, i32) {
    %c0_i32 = arith.constant 0 : i32
    %c0_i32_0 = arith.constant 0 : i32
    return %arg0, %c0_i32 : i32, i32
  }
  func.func @transform_1(%arg0: i32) -> (i32, i32) {
    %c0_i32 = arith.constant 0 : i32
    %c0_i32_0 = arith.constant 0 : i32
    %c0_i32_1 = arith.constant 0 : i32
    return %c0_i32, %c0_i32_0 : i32, i32
  }
  func.func @transform_2(%arg0: i32) -> (i32, i32) {
    %c0_i32 = arith.constant 0 : i32
    %c0_i32_0 = arith.constant 0 : i32
    %c0_i32_1 = arith.constant 0 : i32
    return %c0_i32, %c0_i32_0 : i32, i32
  }
  func.func @transform_3(%arg0: i32) -> (i32, i32) {
    %c0_i32 = arith.constant 0 : i32
    %c0_i32_0 = arith.constant 0 : i32
    return %arg0, %c0_i32 : i32, i32
  }
}

</mosaic_0001>

<bundles_post_ra>
// kernel: pnasnet_feature_extractor.1
= control target key start
LH: loop header
LB: loop body
LE: loop exit
PB: predicated region body
PF: predicated region fallthrough
CT: control target
= control target key end

     0   :  { %vm262_vm0 = vcmask 261120   ;;  %s1402_s1 = inlined_call_operand.vmem [shape: bf16[32,128], index: 1, kind: input, shape index: {}]   ;;  %s1403_s0 = inlined_call_operand.vmem [shape: bf16[512,32], index: 0, kind: input, shape index: {}]   ;;  %s1404_s2 = inlined_call_operand.vmem [shape: f32[1,128], index: 2, kind: input, shape index: {}]   ;;  %s1405_s3 = inlined_call_operand.vmem [shape: f32[512,128], index: 3, kind: output, shape index: {}]  }
   0x1   :  { %v953_v0 = vld [vmem:[%s1402_s1] sm:$0xff]   ;;  %v954_v1 = vld [vmem:[%s1402_s1 + $0x8] sm:$0xff]   ;;  %v959_v6 = vld [vmem:[%s1403_s0 + $0x10] sm:$0xff]  }
   0x2   :  { %881 = vmatprep.subr.bf16.mxu0 %v953_v0  ;;  %949 = vmatprep.subr.bf16.mxu1 %v953_v0  ;;  %v955_v2 = vld [vmem:[%s1403_s0] sm:$0xff]   ;;  %v957_v4 = vld [vmem:[%s1403_s0 + $0x8] sm:$0xff]   ;;  %v960_v7 = vld [vmem:[%s1403_s0 + $0x90] sm:$0xff]  }
   0x3   :  { %882 = vmatpush3.bf16.msra.mxu0 %v953_v0  ;;  %951 = vmatpush3.bf16.msra.mxu1 %v953_v0  ;;  %v956_v3 = vld [vmem:[%s1403_s0 + $0x80] sm:$0xff]   ;;  %v958_v5 = vld [vmem:[%s1403_s0 + $0x88] sm:$0xff]   ;;  %v961_v8 = vld [vmem:[%s1403_s0 + $0x18] sm:$0xff]  }
   0x4   :  { %883 = vmatprep.subr.bf16.mxu0 %v954_v1  ;;  %950 = vmatprep.subr.bf16.mxu1 %v954_v1  ;;  %v962_v9 = vld [vmem:[%s1403_s0 + $0x98] sm:$0xff]   ;;  %v963_v10 = vld [vmem:[%s1403_s0 + $0x20] sm:$0xff]   ;;  %v965_v12 = vld [vmem:[%s1403_s0 + $0x28] sm:$0xff]  }
   0x5   :  { %885 = vmatprep.mubr.msk.bf16.mxu0 %vm262_vm0, %v955_v2  ;;  %917 = vmatprep.mubr.msk.bf16.mxu1 %vm262_vm0, %v956_v3  ;;  %v964_v11 = vld [vmem:[%s1403_s0 + $0xa0] sm:$0xff]   ;;  %v966_v13 = vld [vmem:[%s1403_s0 + $0xa8] sm:$0xff]   ;;  %v967_v14 = vld [vmem:[%s1403_s0 + $0x30] sm:$0xff]  }
   0x6   :  { %v968_v15 = vld [vmem:[%s1403_s0 + $0xb0] sm:$0xff]   ;;  %v969_v16 = vld [vmem:[%s1403_s0 + $0x38] sm:$0xff]   ;;  %v971_v18 = vld [vmem:[%s1403_s0 + $0x40] sm:$0xff]  }
   0x7   :  { %884 = vmatpush3.bf16.msra.mxu0 %v954_v1  ;;  %952 = vmatpush3.bf16.msra.mxu1 %v954_v1  ;;  %v970_v17 = vld [vmem:[%s1403_s0 + $0xb8] sm:$0xff]   ;;  %v972_v19 = vld [vmem:[%s1403_s0 + $0xc0] sm:$0xff]   ;;  %v973_v20 = vld [vmem:[%s1403_s0 + $0x48] sm:$0xff]  }
   0x8   :  { %v974_v21 = vld [vmem:[%s1403_s0 + $0xc8] sm:$0xff]   ;;  %v975_v22 = vld [vmem:[%s1403_s0 + $0x50] sm:$0xff]   ;;  %v977_v24 = vld [vmem:[%s1403_s0 + $0x58] sm:$0xff]  }
   0x9   :  { %v976_v23 = vld [vmem:[%s1403_s0 + $0xd0] sm:$0xff]   ;;  %v978_v25 = vld [vmem:[%s1403_s0 + $0xd8] sm:$0xff]   ;;  %v979_v26 = vld [vmem:[%s1403_s0 + $0x60] sm:$0xff]  }
   0xa   :  { %886 = vmatmul.mubr.msk.bf16.vlgmr.msra.gmra.mrb[0].mxu0 %vm262_vm0, %v957_v4  ;;  %918 = vmatmul.mubr.msk.bf16.vlgmr.msra.gmra.mrb[0].mxu1 %vm262_vm0, %v958_v5  ;;  %v980_v27 = vld [vmem:[%s1403_s0 + $0xe0] sm:$0xff]   ;;  %v981_v28 = vld [vmem:[%s1403_s0 + $0x68] sm:$0xff]   ;;  %v983_v30 = vld [vmem:[%s1403_s0 + $0x70] sm:$0xff]  }
   0xb   :  { %889 = vmatprep.mubr.msk.bf16.mxu0 %vm262_vm0, %v959_v6  ;;  %921 = vmatprep.mubr.msk.bf16.mxu1 %vm262_vm0, %v960_v7  ;;  %v982_v29 = vld [vmem:[%s1403_s0 + $0xe8] sm:$0xff]   ;;  %v984_v31 = vld [vmem:[%s1403_s0 + $0xf0] sm:$0xff]   ;;  %v985_v32 = vld [vmem:[%s1403_s0 + $0x78] sm:$0xff]  }
   0xc   :  { %v986_v33 = vld [vmem:[%s1403_s0 + $0xf8] sm:$0xff]   ;;  %v1144_v34 = vld [vmem:[%s1404_s2] ss:$0 sm:$0xff] }
  0x12   :  { %890 = vmatmul.mubr.msk.bf16.gmra.mrb[4].mxu0 %vm262_vm0, %v961_v8  ;;  %922 = vmatmul.mubr.msk.bf16.gmra.mrb[4].mxu1 %vm262_vm0, %v962_v9 }
  0x13   :  { %893 = vmatprep.mubr.msk.bf16.mxu0 %vm262_vm0, %v963_v10  ;;  %925 = vmatprep.mubr.msk.bf16.mxu1 %vm262_vm0, %v964_v11 }
  0x1a   :  { %894 = vmatmul.mubr.msk.bf16.gmra.mrb[8].mxu0 %vm262_vm0, %v965_v12  ;;  %926 = vmatmul.mubr.msk.bf16.gmra.mrb[8].mxu1 %vm262_vm0, %v966_v13 }
  0x1b   :  { %897 = vmatprep.mubr.msk.bf16.mxu0 %vm262_vm0, %v967_v14  ;;  %929 = vmatprep.mubr.msk.bf16.mxu1 %vm262_vm0, %v968_v15 }
  0x22   :  { %898 = vmatmul.mubr.msk.bf16.gmra.mrb[12].mxu0 %vm262_vm0, %v969_v16  ;;  %930 = vmatmul.mubr.msk.bf16.gmra.mrb[12].mxu1 %vm262_vm0, %v970_v17 }
  0x23   :  { %901 = vmatprep.mubr.msk.bf16.mxu0 %vm262_vm0, %v971_v18  ;;  %933 = vmatprep.mubr.msk.bf16.mxu1 %vm262_vm0, %v972_v19 }
  0x2a   :  { %902 = vmatmul.mubr.msk.bf16.gmra.mrb[16].mxu0 %vm262_vm0, %v973_v20  ;;  %934 = vmatmul.mubr.msk.bf16.gmra.mrb[16].mxu1 %vm262_vm0, %v974_v21 }
  0x2b   :  { %905 = vmatprep.mubr.msk.bf16.mxu0 %vm262_vm0, %v975_v22  ;;  %937 = vmatprep.mubr.msk.bf16.mxu1 %vm262_vm0, %v976_v23 }
  0x32   :  { %906 = vmatmul.mubr.msk.bf16.gmra.mrb[20].mxu0 %vm262_vm0, %v977_v24  ;;  %938 = vmatmul.mubr.msk.bf16.gmra.mrb[20].mxu1 %vm262_vm0, %v978_v25 }
  0x33   :  { %909 = vmatprep.mubr.msk.bf16.mxu0 %vm262_vm0, %v979_v26  ;;  %941 = vmatprep.mubr.msk.bf16.mxu1 %vm262_vm0, %v980_v27 }
  0x3a   :  { %910 = vmatmul.mubr.msk.bf16.gmra.mrb[24].mxu0 %vm262_vm0, %v981_v28  ;;  %942 = vmatmul.mubr.msk.bf16.gmra.mrb[24].mxu1 %vm262_vm0, %v982_v29 }
  0x3b   :  { %913 = vmatprep.mubr.msk.bf16.mxu0 %vm262_vm0, %v983_v30  ;;  %945 = vmatprep.mubr.msk.bf16.mxu1 %vm262_vm0, %v984_v31 }
  0x42   :  { %914 = vmatmul.mubr.msk.bf16.gmra.mrb[28].mxu0 %vm262_vm0, %v985_v32  ;;  %946 = vmatmul.mubr.msk.bf16.gmra.mrb[28].mxu1 %vm262_vm0, %v986_v33 }
  0xdd   :  { %v887_v35 = vpop.f32.mrb[0].mxu0  ;;  %v919_v36 = vpop.f32.mrb[0].mxu1 }
  0xde   :  { %v402_v37 = vadd.f32 %v887_v35, %v1144_v34  ;;  %v530_v38 = vadd.f32 %v919_v36, %v1144_v34  ;;  %v393_v39 = vpop.f32.mrb[1].mxu0  ;;  %v521_v40 = vpop.f32.mrb[1].mxu1 }
  0xdf   :  { %v394_v41 = vadd.f32 %v1144_v34, %v393_v39  ;;  %v522_v42 = vadd.f32 %v1144_v34, %v521_v40  ;;  %v888_v43 = vpop.f32.mrb[2].mxu0  ;;  %v920_v44 = vpop.f32.mrb[2].mxu1 }
  0xe0   :  { %v650_v45 = vmax.f32 %v402_v37, 0.0  ;;  %v682_v46 = vmax.f32 %v530_v38, 0.0  ;;  %v405_v47 = vadd.f32 %v888_v43, %v1144_v34  ;;  %v533_v48 = vadd.f32 %v920_v44, %v1144_v34  ;;  %v396_v49 = vpop.f32.mrb[3].mxu0  ;;  %v524_v50 = vpop.f32.mrb[3].mxu1 }
  0xe1   :  { %v648_v51 = vmax.f32 %v394_v41, 0.0  ;;  %v680_v52 = vmax.f32 %v522_v42, 0.0  ;;  %v397_v53 = vadd.f32 %v1144_v34, %v396_v49  ;;  %v525_v54 = vadd.f32 %v1144_v34, %v524_v50 }
  0xe2   :  { %714 = vst [vmem:[%s1405_s3 + $0x10] sm:$0xff] %v650_v45  ;;  %746 = vst [vmem:[%s1405_s3 + $0x110] sm:$0xff] %v682_v46  ;;  %v651_v55 = vmax.f32 %v405_v47, 0.0  ;;  %v683_v56 = vmax.f32 %v533_v48, 0.0 }
  0xe3   :  { %712 = vst [vmem:[%s1405_s3] sm:$0xff] %v648_v51  ;;  %744 = vst [vmem:[%s1405_s3 + $0x100] sm:$0xff] %v680_v52  ;;  %v649_v57 = vmax.f32 %v397_v53, 0.0  ;;  %v681_v58 = vmax.f32 %v525_v54, 0.0 }
  0xe4   :  { %715 = vst [vmem:[%s1405_s3 + $0x18] sm:$0xff] %v651_v55  ;;  %747 = vst [vmem:[%s1405_s3 + $0x118] sm:$0xff] %v683_v56 }
  0xe5   :  { %713 = vst [vmem:[%s1405_s3 + $0x8] sm:$0xff] %v649_v57  ;;  %745 = vst [vmem:[%s1405_s3 + $0x108] sm:$0xff] %v681_v58  ;;  %v891_v59 = vpop.f32.mrb[4].mxu0  ;;  %v923_v60 = vpop.f32.mrb[4].mxu1 }
  0xe6   :  { %v418_v61 = vadd.f32 %v891_v59, %v1144_v34  ;;  %v546_v62 = vadd.f32 %v923_v60, %v1144_v34  ;;  %v409_v63 = vpop.f32.mrb[5].mxu0  ;;  %v537_v0 = vpop.f32.mrb[5].mxu1 }
  0xe7   :  { %v410_v1 = vadd.f32 %v1144_v34, %v409_v63  ;;  %v538_v2 = vadd.f32 %v1144_v34, %v537_v0  ;;  %v892_v3 = vpop.f32.mrb[6].mxu0  ;;  %v924_v4 = vpop.f32.mrb[6].mxu1 }
  0xe8   :  { %v654_v5 = vmax.f32 %v418_v61, 0.0  ;;  %v686_v6 = vmax.f32 %v546_v62, 0.0  ;;  %v421_v7 = vadd.f32 %v892_v3, %v1144_v34  ;;  %v549_v8 = vadd.f32 %v924_v4, %v1144_v34  ;;  %v412_v9 = vpop.f32.mrb[7].mxu0  ;;  %v540_v10 = vpop.f32.mrb[7].mxu1 }
  0xe9   :  { %v652_v11 = vmax.f32 %v410_v1, 0.0  ;;  %v684_v12 = vmax.f32 %v538_v2, 0.0  ;;  %v413_v13 = vadd.f32 %v1144_v34, %v412_v9  ;;  %v541_v14 = vadd.f32 %v1144_v34, %v540_v10 }
  0xea   :  { %718 = vst [vmem:[%s1405_s3 + $0x30] sm:$0xff] %v654_v5  ;;  %750 = vst [vmem:[%s1405_s3 + $0x130] sm:$0xff] %v686_v6  ;;  %v655_v15 = vmax.f32 %v421_v7, 0.0  ;;  %v687_v16 = vmax.f32 %v549_v8, 0.0 }
  0xeb   :  { %716 = vst [vmem:[%s1405_s3 + $0x20] sm:$0xff] %v652_v11  ;;  %748 = vst [vmem:[%s1405_s3 + $0x120] sm:$0xff] %v684_v12  ;;  %v653_v17 = vmax.f32 %v413_v13, 0.0  ;;  %v685_v18 = vmax.f32 %v541_v14, 0.0 }
  0xec   :  { %719 = vst [vmem:[%s1405_s3 + $0x38] sm:$0xff] %v655_v15  ;;  %751 = vst [vmem:[%s1405_s3 + $0x138] sm:$0xff] %v687_v16 }
  0xed   :  { %717 = vst [vmem:[%s1405_s3 + $0x28] sm:$0xff] %v653_v17  ;;  %749 = vst [vmem:[%s1405_s3 + $0x128] sm:$0xff] %v685_v18  ;;  %v895_v19 = vpop.f32.mrb[8].mxu0  ;;  %v927_v20 = vpop.f32.mrb[8].mxu1 }
  0xee   :  { %v434_v21 = vadd.f32 %v895_v19, %v1144_v34  ;;  %v562_v22 = vadd.f32 %v927_v20, %v1144_v34  ;;  %v425_v23 = vpop.f32.mrb[9].mxu0  ;;  %v553_v24 = vpop.f32.mrb[9].mxu1 }
  0xef   :  { %v426_v25 = vadd.f32 %v1144_v34, %v425_v23  ;;  %v554_v26 = vadd.f32 %v1144_v34, %v553_v24  ;;  %v896_v27 = vpop.f32.mrb[10].mxu0  ;;  %v928_v28 = vpop.f32.mrb[10].mxu1 }
  0xf0   :  { %v658_v29 = vmax.f32 %v434_v21, 0.0  ;;  %v690_v30 = vmax.f32 %v562_v22, 0.0  ;;  %v437_v31 = vadd.f32 %v896_v27, %v1144_v34  ;;  %v565_v32 = vadd.f32 %v928_v28, %v1144_v34  ;;  %v428_v33 = vpop.f32.mrb[11].mxu0  ;;  %v556_v35 = vpop.f32.mrb[11].mxu1 }
  0xf1   :  { %v656_v36 = vmax.f32 %v426_v25, 0.0  ;;  %v688_v37 = vmax.f32 %v554_v26, 0.0  ;;  %v429_v38 = vadd.f32 %v1144_v34, %v428_v33  ;;  %v557_v39 = vadd.f32 %v1144_v34, %v556_v35 }
  0xf2   :  { %722 = vst [vmem:[%s1405_s3 + $0x50] sm:$0xff] %v658_v29  ;;  %754 = vst [vmem:[%s1405_s3 + $0x150] sm:$0xff] %v690_v30  ;;  %v659_v40 = vmax.f32 %v437_v31, 0.0  ;;  %v691_v41 = vmax.f32 %v565_v32, 0.0 }
  0xf3   :  { %720 = vst [vmem:[%s1405_s3 + $0x40] sm:$0xff] %v656_v36  ;;  %752 = vst [vmem:[%s1405_s3 + $0x140] sm:$0xff] %v688_v37  ;;  %v657_v42 = vmax.f32 %v429_v38, 0.0  ;;  %v689_v43 = vmax.f32 %v557_v39, 0.0 }
  0xf4   :  { %723 = vst [vmem:[%s1405_s3 + $0x58] sm:$0xff] %v659_v40  ;;  %755 = vst [vmem:[%s1405_s3 + $0x158] sm:$0xff] %v691_v41 }
  0xf5   :  { %721 = vst [vmem:[%s1405_s3 + $0x48] sm:$0xff] %v657_v42  ;;  %753 = vst [vmem:[%s1405_s3 + $0x148] sm:$0xff] %v689_v43  ;;  %v899_v44 = vpop.f32.mrb[12].mxu0  ;;  %v931_v45 = vpop.f32.mrb[12].mxu1 }
  0xf6   :  { %v450_v46 = vadd.f32 %v899_v44, %v1144_v34  ;;  %v578_v47 = vadd.f32 %v931_v45, %v1144_v34  ;;  %v441_v48 = vpop.f32.mrb[13].mxu0  ;;  %v569_v49 = vpop.f32.mrb[13].mxu1 }
  0xf7   :  { %v442_v50 = vadd.f32 %v1144_v34, %v441_v48  ;;  %v570_v51 = vadd.f32 %v1144_v34, %v569_v49  ;;  %v900_v52 = vpop.f32.mrb[14].mxu0  ;;  %v932_v53 = vpop.f32.mrb[14].mxu1 }
  0xf8   :  { %v662_v54 = vmax.f32 %v450_v46, 0.0  ;;  %v694_v55 = vmax.f32 %v578_v47, 0.0  ;;  %v453_v56 = vadd.f32 %v900_v52, %v1144_v34  ;;  %v581_v57 = vadd.f32 %v932_v53, %v1144_v34  ;;  %v444_v58 = vpop.f32.mrb[15].mxu0  ;;  %v572_v59 = vpop.f32.mrb[15].mxu1 }
  0xf9   :  { %v660_v60 = vmax.f32 %v442_v50, 0.0  ;;  %v692_v61 = vmax.f32 %v570_v51, 0.0  ;;  %v445_v62 = vadd.f32 %v1144_v34, %v444_v58  ;;  %v573_v63 = vadd.f32 %v1144_v34, %v572_v59 }
  0xfa   :  { %726 = vst [vmem:[%s1405_s3 + $0x70] sm:$0xff] %v662_v54  ;;  %758 = vst [vmem:[%s1405_s3 + $0x170] sm:$0xff] %v694_v55  ;;  %v663_v0 = vmax.f32 %v453_v56, 0.0  ;;  %v695_v1 = vmax.f32 %v581_v57, 0.0 }
  0xfb   :  { %724 = vst [vmem:[%s1405_s3 + $0x60] sm:$0xff] %v660_v60  ;;  %756 = vst [vmem:[%s1405_s3 + $0x160] sm:$0xff] %v692_v61  ;;  %v661_v2 = vmax.f32 %v445_v62, 0.0  ;;  %v693_v3 = vmax.f32 %v573_v63, 0.0 }
  0xfc   :  { %727 = vst [vmem:[%s1405_s3 + $0x78] sm:$0xff] %v663_v0  ;;  %759 = vst [vmem:[%s1405_s3 + $0x178] sm:$0xff] %v695_v1 }
  0xfd   :  { %725 = vst [vmem:[%s1405_s3 + $0x68] sm:$0xff] %v661_v2  ;;  %757 = vst [vmem:[%s1405_s3 + $0x168] sm:$0xff] %v693_v3  ;;  %v903_v4 = vpop.f32.mrb[16].mxu0  ;;  %v935_v5 = vpop.f32.mrb[16].mxu1 }
  0xfe   :  { %v466_v6 = vadd.f32 %v903_v4, %v1144_v34  ;;  %v594_v7 = vadd.f32 %v935_v5, %v1144_v34  ;;  %v457_v8 = vpop.f32.mrb[17].mxu0  ;;  %v585_v9 = vpop.f32.mrb[17].mxu1 }
  0xff   :  { %v458_v10 = vadd.f32 %v1144_v34, %v457_v8  ;;  %v586_v11 = vadd.f32 %v1144_v34, %v585_v9  ;;  %v904_v12 = vpop.f32.mrb[18].mxu0  ;;  %v936_v13 = vpop.f32.mrb[18].mxu1 }
 0x100   :  { %v666_v14 = vmax.f32 %v466_v6, 0.0  ;;  %v698_v15 = vmax.f32 %v594_v7, 0.0  ;;  %v469_v16 = vadd.f32 %v904_v12, %v1144_v34  ;;  %v597_v17 = vadd.f32 %v936_v13, %v1144_v34  ;;  %v460_v18 = vpop.f32.mrb[19].mxu0  ;;  %v588_v19 = vpop.f32.mrb[19].mxu1 }
 0x101   :  { %v664_v20 = vmax.f32 %v458_v10, 0.0  ;;  %v696_v21 = vmax.f32 %v586_v11, 0.0  ;;  %v461_v22 = vadd.f32 %v1144_v34, %v460_v18  ;;  %v589_v23 = vadd.f32 %v1144_v34, %v588_v19 }
 0x102   :  { %730 = vst [vmem:[%s1405_s3 + $0x90] sm:$0xff] %v666_v14  ;;  %762 = vst [vmem:[%s1405_s3 + $0x190] sm:$0xff] %v698_v15  ;;  %v667_v24 = vmax.f32 %v469_v16, 0.0  ;;  %v699_v25 = vmax.f32 %v597_v17, 0.0 }
 0x103   :  { %728 = vst [vmem:[%s1405_s3 + $0x80] sm:$0xff] %v664_v20  ;;  %760 = vst [vmem:[%s1405_s3 + $0x180] sm:$0xff] %v696_v21  ;;  %v665_v26 = vmax.f32 %v461_v22, 0.0  ;;  %v697_v27 = vmax.f32 %v589_v23, 0.0 }
 0x104   :  { %731 = vst [vmem:[%s1405_s3 + $0x98] sm:$0xff] %v667_v24  ;;  %763 = vst [vmem:[%s1405_s3 + $0x198] sm:$0xff] %v699_v25 }
 0x105   :  { %729 = vst [vmem:[%s1405_s3 + $0x88] sm:$0xff] %v665_v26  ;;  %761 = vst [vmem:[%s1405_s3 + $0x188] sm:$0xff] %v697_v27  ;;  %v907_v28 = vpop.f32.mrb[20].mxu0  ;;  %v939_v29 = vpop.f32.mrb[20].mxu1 }
 0x106   :  { %v482_v30 = vadd.f32 %v907_v28, %v1144_v34  ;;  %v610_v31 = vadd.f32 %v939_v29, %v1144_v34  ;;  %v473_v32 = vpop.f32.mrb[21].mxu0  ;;  %v601_v33 = vpop.f32.mrb[21].mxu1 }
 0x107   :  { %v474_v35 = vadd.f32 %v1144_v34, %v473_v32  ;;  %v602_v36 = vadd.f32 %v1144_v34, %v601_v33  ;;  %v908_v37 = vpop.f32.mrb[22].mxu0  ;;  %v940_v38 = vpop.f32.mrb[22].mxu1 }
 0x108   :  { %v670_v39 = vmax.f32 %v482_v30, 0.0  ;;  %v702_v40 = vmax.f32 %v610_v31, 0.0  ;;  %v485_v41 = vadd.f32 %v908_v37, %v1144_v34  ;;  %v613_v42 = vadd.f32 %v940_v38, %v1144_v34  ;;  %v476_v43 = vpop.f32.mrb[23].mxu0  ;;  %v604_v44 = vpop.f32.mrb[23].mxu1 }
 0x109   :  { %v668_v45 = vmax.f32 %v474_v35, 0.0  ;;  %v700_v46 = vmax.f32 %v602_v36, 0.0  ;;  %v477_v47 = vadd.f32 %v1144_v34, %v476_v43  ;;  %v605_v48 = vadd.f32 %v1144_v34, %v604_v44 }
 0x10a   :  { %734 = vst [vmem:[%s1405_s3 + $0xb0] sm:$0xff] %v670_v39  ;;  %766 = vst [vmem:[%s1405_s3 + $0x1b0] sm:$0xff] %v702_v40  ;;  %v671_v49 = vmax.f32 %v485_v41, 0.0  ;;  %v703_v50 = vmax.f32 %v613_v42, 0.0 }
 0x10b   :  { %732 = vst [vmem:[%s1405_s3 + $0xa0] sm:$0xff] %v668_v45  ;;  %764 = vst [vmem:[%s1405_s3 + $0x1a0] sm:$0xff] %v700_v46  ;;  %v669_v51 = vmax.f32 %v477_v47, 0.0  ;;  %v701_v52 = vmax.f32 %v605_v48, 0.0 }
 0x10c   :  { %735 = vst [vmem:[%s1405_s3 + $0xb8] sm:$0xff] %v671_v49  ;;  %767 = vst [vmem:[%s1405_s3 + $0x1b8] sm:$0xff] %v703_v50 }
 0x10d   :  { %733 = vst [vmem:[%s1405_s3 + $0xa8] sm:$0xff] %v669_v51  ;;  %765 = vst [vmem:[%s1405_s3 + $0x1a8] sm:$0xff] %v701_v52  ;;  %v911_v53 = vpop.f32.mrb[24].mxu0  ;;  %v943_v54 = vpop.f32.mrb[24].mxu1 }
 0x10e   :  { %v498_v55 = vadd.f32 %v911_v53, %v1144_v34  ;;  %v626_v56 = vadd.f32 %v943_v54, %v1144_v34  ;;  %v489_v57 = vpop.f32.mrb[25].mxu0  ;;  %v617_v58 = vpop.f32.mrb[25].mxu1 }
 0x10f   :  { %v490_v59 = vadd.f32 %v1144_v34, %v489_v57  ;;  %v618_v60 = vadd.f32 %v1144_v34, %v617_v58  ;;  %v912_v61 = vpop.f32.mrb[26].mxu0  ;;  %v944_v62 = vpop.f32.mrb[26].mxu1 }
 0x110   :  { %v674_v63 = vmax.f32 %v498_v55, 0.0  ;;  %v706_v0 = vmax.f32 %v626_v56, 0.0  ;;  %v501_v1 = vadd.f32 %v912_v61, %v1144_v34  ;;  %v629_v2 = vadd.f32 %v944_v62, %v1144_v34  ;;  %v492_v3 = vpop.f32.mrb[27].mxu0  ;;  %v620_v4 = vpop.f32.mrb[27].mxu1 }
 0x111   :  { %v672_v5 = vmax.f32 %v490_v59, 0.0  ;;  %v704_v6 = vmax.f32 %v618_v60, 0.0  ;;  %v493_v7 = vadd.f32 %v1144_v34, %v492_v3  ;;  %v621_v8 = vadd.f32 %v1144_v34, %v620_v4 }
 0x112   :  { %738 = vst [vmem:[%s1405_s3 + $0xd0] sm:$0xff] %v674_v63  ;;  %770 = vst [vmem:[%s1405_s3 + $0x1d0] sm:$0xff] %v706_v0  ;;  %v675_v9 = vmax.f32 %v501_v1, 0.0  ;;  %v707_v10 = vmax.f32 %v629_v2, 0.0 }
 0x113   :  { %736 = vst [vmem:[%s1405_s3 + $0xc0] sm:$0xff] %v672_v5  ;;  %768 = vst [vmem:[%s1405_s3 + $0x1c0] sm:$0xff] %v704_v6  ;;  %v673_v11 = vmax.f32 %v493_v7, 0.0  ;;  %v705_v12 = vmax.f32 %v621_v8, 0.0 }
 0x114   :  { %739 = vst [vmem:[%s1405_s3 + $0xd8] sm:$0xff] %v675_v9  ;;  %771 = vst [vmem:[%s1405_s3 + $0x1d8] sm:$0xff] %v707_v10 }
 0x115   :  { %737 = vst [vmem:[%s1405_s3 + $0xc8] sm:$0xff] %v673_v11  ;;  %769 = vst [vmem:[%s1405_s3 + $0x1c8] sm:$0xff] %v705_v12  ;;  %v915_v13 = vpop.f32.mrb[28].mxu0  ;;  %v947_v14 = vpop.f32.mrb[28].mxu1 }
 0x116   :  { %v514_v15 = vadd.f32 %v915_v13, %v1144_v34  ;;  %v642_v16 = vadd.f32 %v947_v14, %v1144_v34  ;;  %v505_v17 = vpop.f32.mrb[29].mxu0  ;;  %v633_v18 = vpop.f32.mrb[29].mxu1 }
 0x117   :  { %v506_v19 = vadd.f32 %v1144_v34, %v505_v17  ;;  %v634_v20 = vadd.f32 %v1144_v34, %v633_v18  ;;  %v916_v21 = vpop.f32.mrb[30].mxu0  ;;  %v948_v22 = vpop.f32.mrb[30].mxu1 }
 0x118   :  { %v678_v23 = vmax.f32 %v514_v15, 0.0  ;;  %v710_v24 = vmax.f32 %v642_v16, 0.0  ;;  %v517_v25 = vadd.f32 %v916_v21, %v1144_v34  ;;  %v645_v26 = vadd.f32 %v948_v22, %v1144_v34  ;;  %v508_v27 = vpop.f32.mrb[31].mxu0  ;;  %v636_v28 = vpop.f32.mrb[31].mxu1 }
 0x119   :  { %v676_v29 = vmax.f32 %v506_v19, 0.0  ;;  %v708_v30 = vmax.f32 %v634_v20, 0.0  ;;  %v509_v31 = vadd.f32 %v1144_v34, %v508_v27  ;;  %v637_v32 = vadd.f32 %v1144_v34, %v636_v28 }
 0x11a   :  { %742 = vst [vmem:[%s1405_s3 + $0xf0] sm:$0xff] %v678_v23  ;;  %774 = vst [vmem:[%s1405_s3 + $0x1f0] sm:$0xff] %v710_v24  ;;  %v679_v33 = vmax.f32 %v517_v25, 0.0  ;;  %v711_v35 = vmax.f32 %v645_v26, 0.0 }
 0x11b   :  { %740 = vst [vmem:[%s1405_s3 + $0xe0] sm:$0xff] %v676_v29  ;;  %772 = vst [vmem:[%s1405_s3 + $0x1e0] sm:$0xff] %v708_v30  ;;  %v677_v36 = vmax.f32 %v509_v31, 0.0  ;;  %v709_v34 = vmax.f32 %v637_v32, 0.0 }
 0x11c   :  { %743 = vst [vmem:[%s1405_s3 + $0xf8] sm:$0xff] %v679_v33  ;;  %775 = vst [vmem:[%s1405_s3 + $0x1f8] sm:$0xff] %v711_v35 }
 0x11d   :  { %741 = vst [vmem:[%s1405_s3 + $0xe8] sm:$0xff] %v677_v36  ;;  %773 = vst [vmem:[%s1405_s3 + $0x1e8] sm:$0xff] %v709_v34 }

</bundles_post_ra>
